<compile_context>
chip_gen: v7x
topology: tpu7x:2x2x1
jax: 0.10.0
libtpu: 0.0.40
codegen_flags: <defaults>
</compile_context>

<pallas_src>
import functools

import jax
import jax.numpy as jnp
from jax.experimental import pallas as pl
from jax.experimental.pallas import tpu as pltpu


def _round_up(x, m):
    return ((x + m - 1) // m) * m


def token_encoder_kernel(ids_ref, w_ref, out_ref, *, pad_idx):
    ids = ids_ref[...]                                   # (TB, T) int32
    tb, t_len = ids.shape
    v = w_ref.shape[0]

    # lane iota over the vocab axis, reused for one-hot build and pad masking.
    lane_v = jax.lax.broadcasted_iota(jnp.int32, (tb, v), 1)   # (TB, V)

    # counts[b, v] = #occurrences of token v in row b, built as a 2-D accumulate
    # over the (small, static) token axis — no (TB, T, V) intermediate.
    counts = jnp.zeros((tb, v), jnp.float32)
    for t in range(t_len):                                # static, fully unrolled
        counts = counts + (ids[:, t:t + 1] == lane_v).astype(jnp.float32)

    if pad_idx is not None:
        # nn.Embedding(padding_idx=...): pad tokens contribute zero.
        counts = counts * (lane_v != pad_idx).astype(jnp.float32)

    # sum of embeddings == counts @ W  (single MXU matmul, f32 accumulation)
    out_ref[...] = jnp.dot(counts, w_ref[...],
                           preferred_element_type=jnp.float32)


def token_encoder_forward(contexts, weight, pad_idx=None, *, tile_b=None):
    """contexts: (B, T) int, weight: (V, E) float32 -> (B, E) float32."""
    contexts = contexts.astype(jnp.int32)
    B, T = contexts.shape
    V, E = weight.shape

    if tile_b is None:
        # Fill the MXU M dim (128) when the batch allows; otherwise one block
        # covering the whole (sublane-rounded) batch.
        tile_b = min(128, _round_up(B, 8))

    # Ragged batch: pad rows (values are irrelevant — compare-based one-hot never
    # dereferences them) and slice the output back to B.
    B_pad = _round_up(B, tile_b)
    if B_pad != B:
        contexts = jnp.pad(contexts, ((0, B_pad - B), (0, 0)))
    grid = (B_pad // tile_b,)

    kernel = functools.partial(token_encoder_kernel, pad_idx=pad_idx)

    # VMEM budget: double-buffered table + double-buffered ids/out tiles + slack.
    vmem_need = 2 * V * E * 4 + 2 * tile_b * (T + E) * 4 + (2 << 20)
    vmem_limit = int(max(vmem_need, 32 << 20))

    out = pl.pallas_call(
        kernel,
        out_shape=jax.ShapeDtypeStruct((B_pad, E), jnp.float32),
        grid_spec=pltpu.PrefetchScalarGridSpec(
            num_scalar_prefetch=0,
            grid=grid,
            in_specs=[
                pl.BlockSpec((tile_b, T), lambda i: (i, 0)),   # token-id tile
                pl.BlockSpec((V, E), lambda i: (0, 0)),        # full embedding table
            ],
            out_specs=pl.BlockSpec((tile_b, E), lambda i: (i, 0)),  # lane-dense out
        ),
        compiler_params=pltpu.CompilerParams(
            dimension_semantics=("parallel",),
            vmem_limit_bytes=vmem_limit,
        ),
    )(contexts, weight)
    return out[:B]


def reference_forward(contexts, weight, pad_idx=None):
    if pad_idx is not None:
        weight = weight.at[pad_idx].set(0.0)
    emb = weight[contexts]              # (B, T, E)
    return emb.sum(axis=1)              # (B, E)


if __name__ == "__main__":
    # Module hyper-params (small, consistent with the forward pass)
    token_len = 8          # max_token_len (T)
    vocab_size = 64        # V
    embedding_size = 128   # E
    pad_idx = 0
    B = 16                 # batch

    key = jax.random.PRNGKey(0)
    k_ids, k_w, k_ids2 = jax.random.split(key, 3)

    contexts = jax.random.randint(k_ids, (B, token_len), 0, vocab_size,
                                  dtype=jnp.int32)
    weight = jax.random.normal(k_w, (vocab_size, embedding_size),
                               dtype=jnp.float32)

    # Branch 1: pad_idx set (nn.Embedding + sum over token dim)
    out_pad = jax.block_until_ready(
        token_encoder_forward(contexts, weight, pad_idx=pad_idx))
    ref_pad = reference_forward(contexts, weight, pad_idx=pad_idx)

    # Branch 2: pad_idx is None (EmbeddingBag sum)
    out_bag = jax.block_until_ready(
        token_encoder_forward(contexts, weight, pad_idx=None))
    ref_bag = reference_forward(contexts, weight, pad_idx=None)

    # Ragged batch (exercises wrapper padding + output slice)
    contexts_r = jax.random.randint(k_ids2, (10, token_len), 0, vocab_size,
                                    dtype=jnp.int32)
    out_r = jax.block_until_ready(
        token_encoder_forward(contexts_r, weight, pad_idx=pad_idx))
    ref_r = reference_forward(contexts_r, weight, pad_idx=pad_idx)

    assert out_pad.shape == (B, embedding_size)
    assert out_bag.shape == (B, embedding_size)
    assert out_r.shape == (10, embedding_size)
    assert jnp.allclose(out_pad, ref_pad, atol=1e-5, rtol=1e-5)
    assert jnp.allclose(out_bag, ref_bag, atol=1e-5, rtol=1e-5)
    assert jnp.allclose(out_r, ref_r, atol=1e-5, rtol=1e-5)

    print("KERNEL_OK")
</pallas_src>

<mosaic_0001>
module attributes {stable_mosaic.version = 11 : i64} {
  func.func @token_encoder_kernel(%arg0: i32, %arg1: memref<16x8xi32, #tpu.memory_space<vmem>>, %arg2: memref<64x128xf32, #tpu.memory_space<vmem>>, %arg3: memref<16x128xf32, #tpu.memory_space<vmem>>) attributes {dimension_semantics = [#tpu.dimension_semantics<parallel>], iteration_bounds = array<i64: 1>, scalar_prefetch = 0 : i64, scratch_operands = 0 : i64, tpu.core_type = #tpu.core_type<tc>, window_params = [{transform_indices = @transform_0, window_bounds = array<i64: 16, 8>}, {pipeline_mode = #tpu.pipeline_mode<synchronous>, transform_indices = @transform_1, window_bounds = array<i64: 64, 128>}, {transform_indices = @transform_2, window_bounds = array<i64: 16, 128>}]} {
    %c0 = arith.constant 0 : index
    %c0_0 = arith.constant 0 : index
    %0 = vector.load %arg1[%c0, %c0_0] : memref<16x8xi32, #tpu.memory_space<vmem>>, vector<16x8xi32>
    %1 = tpu.iota {dimensions = array<i32: 1>} : vector<16x64xi32>
    %cst = arith.constant 0.000000e+00 : f32
    %2 = vector.broadcast %cst : f32 to vector<16x64xf32>
    %3 = vector.extract_strided_slice %0 {offsets = [0, 0], sizes = [16, 1], strides = [1, 1]} : vector<16x8xi32> to vector<16x1xi32>
    %4 = vector.broadcast %3 : vector<16x1xi32> to vector<16x64xi32>
    %5 = arith.cmpi eq, %4, %1 : vector<16x64xi32>
    %6 = arith.extui %5 : vector<16x64xi1> to vector<16x64xi32>
    %7 = arith.sitofp %6 : vector<16x64xi32> to vector<16x64xf32>
    %8 = arith.addf %2, %7 : vector<16x64xf32>
    %9 = vector.extract_strided_slice %0 {offsets = [0, 1], sizes = [16, 1], strides = [1, 1]} : vector<16x8xi32> to vector<16x1xi32>
    %10 = vector.broadcast %9 : vector<16x1xi32> to vector<16x64xi32>
    %11 = arith.cmpi eq, %10, %1 : vector<16x64xi32>
    %12 = arith.extui %11 : vector<16x64xi1> to vector<16x64xi32>
    %13 = arith.sitofp %12 : vector<16x64xi32> to vector<16x64xf32>
    %14 = arith.addf %8, %13 : vector<16x64xf32>
    %15 = vector.extract_strided_slice %0 {offsets = [0, 2], sizes = [16, 1], strides = [1, 1]} : vector<16x8xi32> to vector<16x1xi32>
    %16 = vector.broadcast %15 : vector<16x1xi32> to vector<16x64xi32>
    %17 = arith.cmpi eq, %16, %1 : vector<16x64xi32>
    %18 = arith.extui %17 : vector<16x64xi1> to vector<16x64xi32>
    %19 = arith.sitofp %18 : vector<16x64xi32> to vector<16x64xf32>
    %20 = arith.addf %14, %19 : vector<16x64xf32>
    %21 = vector.extract_strided_slice %0 {offsets = [0, 3], sizes = [16, 1], strides = [1, 1]} : vector<16x8xi32> to vector<16x1xi32>
    %22 = vector.broadcast %21 : vector<16x1xi32> to vector<16x64xi32>
    %23 = arith.cmpi eq, %22, %1 : vector<16x64xi32>
    %24 = arith.extui %23 : vector<16x64xi1> to vector<16x64xi32>
    %25 = arith.sitofp %24 : vector<16x64xi32> to vector<16x64xf32>
    %26 = arith.addf %20, %25 : vector<16x64xf32>
    %27 = vector.extract_strided_slice %0 {offsets = [0, 4], sizes = [16, 1], strides = [1, 1]} : vector<16x8xi32> to vector<16x1xi32>
    %28 = vector.broadcast %27 : vector<16x1xi32> to vector<16x64xi32>
    %29 = arith.cmpi eq, %28, %1 : vector<16x64xi32>
    %30 = arith.extui %29 : vector<16x64xi1> to vector<16x64xi32>
    %31 = arith.sitofp %30 : vector<16x64xi32> to vector<16x64xf32>
    %32 = arith.addf %26, %31 : vector<16x64xf32>
    %33 = vector.extract_strided_slice %0 {offsets = [0, 5], sizes = [16, 1], strides = [1, 1]} : vector<16x8xi32> to vector<16x1xi32>
    %34 = vector.broadcast %33 : vector<16x1xi32> to vector<16x64xi32>
    %35 = arith.cmpi eq, %34, %1 : vector<16x64xi32>
    %36 = arith.extui %35 : vector<16x64xi1> to vector<16x64xi32>
    %37 = arith.sitofp %36 : vector<16x64xi32> to vector<16x64xf32>
    %38 = arith.addf %32, %37 : vector<16x64xf32>
    %39 = vector.extract_strided_slice %0 {offsets = [0, 6], sizes = [16, 1], strides = [1, 1]} : vector<16x8xi32> to vector<16x1xi32>
    %40 = vector.broadcast %39 : vector<16x1xi32> to vector<16x64xi32>
    %41 = arith.cmpi eq, %40, %1 : vector<16x64xi32>
    %42 = arith.extui %41 : vector<16x64xi1> to vector<16x64xi32>
    %43 = arith.sitofp %42 : vector<16x64xi32> to vector<16x64xf32>
    %44 = arith.addf %38, %43 : vector<16x64xf32>
    %45 = vector.extract_strided_slice %0 {offsets = [0, 7], sizes = [16, 1], strides = [1, 1]} : vector<16x8xi32> to vector<16x1xi32>
    %46 = vector.broadcast %45 : vector<16x1xi32> to vector<16x64xi32>
    %47 = arith.cmpi eq, %46, %1 : vector<16x64xi32>
    %48 = arith.extui %47 : vector<16x64xi1> to vector<16x64xi32>
    %49 = arith.sitofp %48 : vector<16x64xi32> to vector<16x64xf32>
    %50 = arith.addf %44, %49 : vector<16x64xf32>
    %c0_i32 = arith.constant 0 : i32
    %51 = vector.broadcast %c0_i32 : i32 to vector<16x64xi32>
    %52 = arith.cmpi ne, %1, %51 : vector<16x64xi32>
    %53 = arith.extui %52 : vector<16x64xi1> to vector<16x64xi32>
    %54 = arith.sitofp %53 : vector<16x64xi32> to vector<16x64xf32>
    %55 = arith.mulf %50, %54 : vector<16x64xf32>
    %c0_1 = arith.constant 0 : index
    %c0_2 = arith.constant 0 : index
    %56 = vector.load %arg2[%c0_1, %c0_2] : memref<64x128xf32, #tpu.memory_space<vmem>>, vector<64x128xf32>
    %cst_3 = arith.constant dense<0.000000e+00> : vector<16x128xf32>
    %57 = tpu.matmul %55, %56, %cst_3 {dimension_numbers = #tpu.dot_dimension_numbers<[1], [0], [0], [1], [0, 0, 1, 1], [], []>} : vector<16x64xf32>, vector<64x128xf32>, vector<16x128xf32> -> vector<16x128xf32>
    %c0_4 = arith.constant 0 : index
    %c0_5 = arith.constant 0 : index
    %58 = vector.load %arg3[%c0_4, %c0_5] : memref<16x128xf32, #tpu.memory_space<vmem>>, vector<16x128xf32>
    tpu.vector_store %arg3[%c0_4, %c0_5], %57 {strides = array<i32>} : memref<16x128xf32, #tpu.memory_space<vmem>>, vector<16x128xf32>,
    return
  }
  func.func @transform_0(%arg0: i32) -> (i32, i32) {
    %c0_i32 = arith.constant 0 : i32
    %c0_i32_0 = arith.constant 0 : i32
    return %arg0, %c0_i32 : i32, i32
  }
  func.func @transform_1(%arg0: i32) -> (i32, i32) {
    %c0_i32 = arith.constant 0 : i32
    %c0_i32_0 = arith.constant 0 : i32
    %c0_i32_1 = arith.constant 0 : i32
    return %c0_i32, %c0_i32_0 : i32, i32
  }
  func.func @transform_2(%arg0: i32) -> (i32, i32) {
    %c0_i32 = arith.constant 0 : i32
    %c0_i32_0 = arith.constant 0 : i32
    return %arg0, %c0_i32 : i32, i32
  }
}

</mosaic_0001>

<bundles_post_ra>
// kernel: tpu_custom_call.1
= control target key start
LH: loop header
LB: loop body
LE: loop exit
PB: predicated region body
PF: predicated region fallthrough
CT: control target
= control target key end

     0   :  { %7 = vsyncpa [#allocation3], 0  ;;  %s478_s0 = inlined_call_operand.vmem [shape: s32[16,8], index: 0, kind: input, shape index: {}]   ;;  %s479_s1 = inlined_call_operand.hbm [shape: f32[64,128], index: 1, kind: input, shape index: {}]   ;;  %s480_s2 = inlined_call_operand.hbm [shape: f32[16,128], index: 2, kind: output, shape index: {}]  }
   0x1   :  { %8 = vsyncpa [#allocation4], 0  ;;  %s395_s9 = smov [#allocation2]   ;;  %s347_s13 = scalar_lea.hbm %s479_s1, 1024 }
   0x2   :  { %s16_s10 = sshll.u32 %s395_s9, 4  ;;  %p348_p0 = scmp.ne.s32.totalorder %s479_s1, %s347_s13  ;;  %s17_s10 = int_to_ptr.vmem [resolvable:$true] %s16_s10 }
   0x3   :  { %p351_p1 = scmp.lt.u32.totalorder %s347_s13, %s479_s1 }
   0x5   :  { %p353_p2 = pnand %p351_p1, %p348_p0 }
   0x7   :  { %356 = shalt.err (!%p353_p2)
}
   0x8   :  { %s357_s18 = scalar_lea.vmem %s17_s10, 1024  ;;  %p362_p4 = scmp.lt.s32.totalorder %s17_s10, %s17_s10 }
   0x9   :  { %p358_p3 = scmp.ne.s32.totalorder %s17_s10, %s357_s18  ;;  %p363_p5 = scmp.lt.s32.totalorder %s357_s18, %s357_s18 }
   0xb   :  { %p364_p6 = por %p363_p5, %p362_p4 }
   0xd   :  { %p365_p7 = pnand %p364_p6, %p358_p3 }
   0xf   :  { %368 = shalt.err (!%p365_p7)
}
  0x10   :  { %s396_s19 = smov 128   ;;  %s397_s20 = smov 8  }
  0x11   :  { %22 = dma.hbm_to_vmem [thread:$0]  %s479_s1, 1024, %s17_s10, [#allocation3], %s396_s19, %s396_s19, %s397_s20  }
  0x12   :  { %391 = dma.done.wait [#allocation3], 1024  }
  0x13   :  { %392 = vsyncadd [#allocation3], 4294966272  ;;  %v398_v0 = vmov 0   ;;  %v27_v1 = vld [vmem:[%s478_s0 + $0x8] sm:$0xff]  ;;  %v26_v2 = vld [vmem:[%s478_s0] sm:$0xff]  ;;  %v399_v3 = vmov 1   ;;  %v28_v26 = vlaneseq }
  0x14   :  { %335 = vset.pattern.permute.xlu1 %v398_v0  ;;  %333 = vset.pattern.permute.xlu0 %v398_v0  ;;  %v400_v4 = vmov 2   ;;  %v401_v5 = vmov 3   ;;  %v402_v6 = vmov 4   ;;  %v403_v7 = vmov 5   ;;  %v147_v9 = vld [vmem:[#allocation2] sm:$0xff]  ;;  %v148_v10 = vld [vmem:[#allocation2 + $0x8] sm:$0xff] }
  0x15   :  { %34 = vperm.xlu1 %335, %v27_v1   ;;  %31 = vperm.xlu0 %333, %v26_v2   ;;  %v404_v8 = vmov 7   ;;  %v304_v11 = vpack.c.bf16 %v148_v10, %v147_v9  ;;  %v405_v12 = vmov 6   ;;  %v149_v13 = vld [vmem:[#allocation2 + $0x10] sm:$0xff]  ;;  %v150_v14 = vld [vmem:[#allocation2 + $0x18] sm:$0xff]  ;;  %v151_v16 = vld [vmem:[#allocation2 + $0x20] sm:$0xff]  ;;  %v444_v28 = vand.u32 127, %v28_v26 }
  0x16   :  { %v308_v15 = vpack.c.bf16 %v150_v14, %v149_v13  ;;  %v152_v17 = vld [vmem:[#allocation2 + $0x28] sm:$0xff]  ;;  %v153_v19 = vld [vmem:[#allocation2 + $0x30] sm:$0xff]  ;;  %v154_v20 = vld [vmem:[#allocation2 + $0x38] sm:$0xff]  ;;  %v406_v32 = vmov 0.0   ;;  %s407_s0 = smov [#allocation5]  }
  0x17   :  { %305 = vmatprep.subr.bf16.mxu0 %v304_v11  ;;  %v312_v18 = vpack.c.bf16 %v152_v17, %v151_v16  ;;  %v316_v21 = vpack.c.bf16 %v154_v20, %v153_v19  ;;  %vm142_vm13 = vcmp.ne.s32.totalorder %v444_v28, 0  ;;  %s244_s1 = sshll.u32 %s407_s0, 4  ;;  %s245_s1 = int_to_ptr.vmem [resolvable:$true] %s244_s1 }
  0x18   :  { %307 = vmatpush3.bf16.msra.mxu0 %v304_v11  ;;  %v272_v63 = vsel %vm142_vm13, 1.0, %v406_v32  ;;  %s369_s27 = scalar_lea.vmem %s245_s1, 256  ;;  %p374_p9 = scmp.lt.s32.totalorder %s245_s1, %s245_s1 }
  0x19   :  { %336 = vset.pattern.permute.xlu1 %v399_v3  ;;  %334 = vset.pattern.permute.xlu0 %v399_v3  ;;  %p370_p8 = scmp.ne.s32.totalorder %s245_s1, %s369_s27  ;;  %p375_p10 = scmp.lt.s32.totalorder %s369_s27, %s369_s27 }
  0x1a   :  { %48 = vperm.xlu1 %336, %v27_v1   ;;  %45 = vperm.xlu0 %334, %v26_v2  }
  0x1b   :  { %309 = vmatprep.subr.bf16.mxu0 %v308_v15  ;;  %p376_p11 = por %p375_p10, %p374_p9 }
  0x1c   :  { %311 = vmatpush3.bf16.msra.mxu0 %v308_v15 }
  0x1d   :  { %313 = vmatprep.subr.bf16.mxu0 %v312_v18  ;;  %p377_p12 = pnand %p376_p11, %p370_p8 }
  0x1e   :  { %337 = vset.pattern.permute.xlu1 %v400_v4  ;;  %338 = vset.pattern.permute.xlu0 %v400_v4 }
  0x1f   :  { %59 = vperm.xlu1 %337, %v26_v2   ;;  %62 = vperm.xlu0 %338, %v27_v1  }
  0x20   :  { %315 = vmatpush3.bf16.msra.mxu0 %v312_v18 }
  0x21   :  { %317 = vmatprep.subr.bf16.mxu0 %v316_v21 }
  0x23   :  { %339 = vset.pattern.permute.xlu1 %v401_v5  ;;  %340 = vset.pattern.permute.xlu0 %v402_v6 }
  0x24   :  { %73 = vperm.xlu1 %339, %v26_v2   ;;  %87 = vperm.xlu0 %340, %v26_v2  }
  0x25   :  { %319 = vmatpush3.bf16.msra.mxu0 %v316_v21 }
  0x28   :  { %76 = vperm.xlu1 %339, %v27_v1   ;;  %343 = vset.pattern.permute.xlu0 %v403_v7 }
  0x29   :  { %104 = vperm.xlu0 %343, %v27_v1  }
  0x2c   :  { %341 = vset.pattern.permute.xlu1 %v402_v6 }
  0x2d   :  { %90 = vperm.xlu1 %341, %v27_v1   ;;  %345 = vset.pattern.permute.xlu0 %v404_v8 }
  0x2e   :  { %129 = vperm.xlu0 %345, %v26_v2  }
  0x31   :  { %342 = vset.pattern.permute.xlu1 %v403_v7 }
  0x32   :  { %101 = vperm.xlu1 %342, %v26_v2  }
  0x36   :  { %344 = vset.pattern.permute.xlu1 %v405_v12 }
  0x37   :  { %115 = vperm.xlu1 %344, %v26_v2  }
  0x3b   :  { %118 = vperm.xlu1 %344, %v27_v1  }
  0x3f   :  { %346 = vset.pattern.permute.xlu1 %v404_v8 }
  0x40   :  { %132 = vperm.xlu1 %346, %v27_v1  }
  0x94   :  { %v35_v22 = vpop.permute.xlu1 %34  ;;  %v32_v24 = vpop.permute.xlu0 %31 }
  0x95   :  { %vm36_vm0 = vcmp.eq.s32.totalorder %v32_v24, %v444_v28  ;;  %vm37_vm6 = vcmp.eq.s32.totalorder %v35_v22, %v444_v28 }
  0x96   :  { %v256_v33 = vsel %vm36_vm0, 1.0, %v406_v32  ;;  %v257_v47 = vsel %vm37_vm6, 1.0, %v406_v32  ;;  %vm155_vm0 = vcmask 523264  }
  0x99   :  { %v49_v23 = vpop.permute.xlu1 %48  ;;  %v46_v27 = vpop.permute.xlu0 %45 }
  0x9a   :  { %vm50_vm1 = vcmp.eq.s32.totalorder %v46_v27, %v444_v28  ;;  %vm51_vm4 = vcmp.eq.s32.totalorder %v49_v23, %v444_v28 }
  0x9b   :  { %v258_v34 = vsel %vm50_vm1, 1.0, %v406_v32  ;;  %v259_v42 = vsel %vm51_vm4, 1.0, %v406_v32 }
  0x9c   :  { %v56_v36 = vadd.f32 %v258_v34, %v256_v33  ;;  %v57_v49 = vadd.f32 %v259_v42, %v257_v47 }
  0x9e   :  { %v60_v25 = vpop.permute.xlu1 %59  ;;  %v63_v30 = vpop.permute.xlu0 %62 }
  0x9f   :  { %vm64_vm2 = vcmp.eq.s32.totalorder %v60_v25, %v444_v28  ;;  %vm65_vm7 = vcmp.eq.s32.totalorder %v63_v30, %v444_v28 }
  0xa0   :  { %v260_v37 = vsel %vm64_vm2, 1.0, %v406_v32  ;;  %v261_v48 = vsel %vm65_vm7, 1.0, %v406_v32 }
  0xa1   :  { %v70_v41 = vadd.f32 %v260_v37, %v56_v36  ;;  %v71_v53 = vadd.f32 %v261_v48, %v57_v49 }
  0xa3   :  { %v74_v29 = vpop.permute.xlu1 %73  ;;  %v88_v35 = vpop.permute.xlu0 %87 }
  0xa4   :  { %vm78_vm3 = vcmp.eq.s32.totalorder %v74_v29, %v444_v28  ;;  %vm92_vm5 = vcmp.eq.s32.totalorder %v88_v35, %v444_v28 }
  0xa5   :  { %v262_v39 = vsel %vm78_vm3, 1.0, %v406_v32  ;;  %v264_v45 = vsel %vm92_vm5, 1.0, %v406_v32 }
  0xa6   :  { %v84_v43 = vadd.f32 %v262_v39, %v70_v41 }
  0xa7   :  { %v77_v31 = vpop.permute.xlu1 %76 }
  0xa8   :  { %v105_v40 = vpop.permute.xlu0 %104  ;;  %vm79_vm8 = vcmp.eq.s32.totalorder %v77_v31, %v444_v28  ;;  %v98_v51 = vadd.f32 %v264_v45, %v84_v43 }
  0xa9   :  { %v263_v52 = vsel %vm79_vm8, 1.0, %v406_v32  ;;  %vm107_vm14 = vcmp.eq.s32.totalorder %v105_v40, %v444_v28 }
  0xaa   :  { %v85_v57 = vadd.f32 %v263_v52, %v71_v53  ;;  %v267_v0 = vsel %vm107_vm14, 1.0, %v406_v32 }
  0xac   :  { %v91_v38 = vpop.permute.xlu1 %90 }
  0xad   :  { %v130_v46 = vpop.permute.xlu0 %129  ;;  %vm93_vm10 = vcmp.eq.s32.totalorder %v91_v38, %v444_v28 }
  0xae   :  { %vm134_vm11 = vcmp.eq.s32.totalorder %v130_v46, %v444_v28  ;;  %v265_v55 = vsel %vm93_vm10, 1.0, %v406_v32 }
  0xaf   :  { %v270_v59 = vsel %vm134_vm11, 1.0, %v406_v32  ;;  %v99_v61 = vadd.f32 %v265_v55, %v85_v57 }
  0xb1   :  { %v102_v44 = vpop.permute.xlu1 %101  ;;  %v113_v4 = vadd.f32 %v267_v0, %v99_v61 }
  0xb2   :  { %vm106_vm9 = vcmp.eq.s32.totalorder %v102_v44, %v444_v28 }
  0xb3   :  { %v266_v50 = vsel %vm106_vm9, 1.0, %v406_v32 }
  0xb4   :  { %v112_v56 = vadd.f32 %v266_v50, %v98_v51 }
  0xb6   :  { %v116_v54 = vpop.permute.xlu1 %115 }
  0xb7   :  { %vm120_vm12 = vcmp.eq.s32.totalorder %v116_v54, %v444_v28 }
  0xb8   :  { %v268_v58 = vsel %vm120_vm12, 1.0, %v406_v32 }
  0xb9   :  { %v126_v60 = vadd.f32 %v268_v58, %v112_v56 }
  0xba   :  { %v119_v62 = vpop.permute.xlu1 %118 }
  0xbb   :  { %v140_v1 = vadd.f32 %v270_v59, %v126_v60  ;;  %vm121_vm15 = vcmp.eq.s32.totalorder %v119_v62, %v444_v28 }
  0xbc   :  { %v269_v2 = vsel %vm121_vm15, 1.0, %v406_v32 }
  0xbd   :  { %v145_v3 = vmul.f32 %v272_v63, %v140_v1  ;;  %v127_v6 = vadd.f32 %v269_v2, %v113_v4 }
  0xbf   :  { %v133_v5 = vpop.permute.xlu1 %132  ;;  %301 = vmatprep.mubr.msk.f32.mxu0 %vm155_vm0, %v145_v3 }
  0xc0   :  { %vm135_vm1 = vcmp.eq.s32.totalorder %v133_v5, %v444_v28 }
  0xc1   :  { %v271_v7 = vsel %vm135_vm1, 1.0, %v406_v32 }
  0xc2   :  { %v141_v8 = vadd.f32 %v271_v7, %v127_v6 }
  0xc4   :  { %v146_v9 = vmul.f32 %v272_v63, %v141_v8 }
  0xc6   :  { %302 = vmatmul.mubr.msk.f32.vlgmr.msra.gmra.mrb[0].mxu0 %vm155_vm0, %v146_v9 }
 0x199   :  { %v303_v10 = vpop.f32.mrb[0].mxu0 }
 0x19a   :  { %238 = vst [vmem:[#allocation5 + $0x8] sm:$0xff] %v303_v10  ;;  %v228_v11 = vpop.f32.mrb[1].mxu0 }
 0x19b   :  { %237 = vst [vmem:[#allocation5] sm:$0xff] %v228_v11 }
 0x19c   :  { %380 = shalt.err (!%p377_p12)
}
 0x19d   :  { %s381_s30 = scalar_lea.hbm %s480_s2, 256 }
 0x19e   :  { %p382_p13 = scmp.ne.s32.totalorder %s480_s2, %s381_s30  ;;  %p385_p0 = scmp.lt.u32.totalorder %s381_s30, %s480_s2 }
 0x1a0   :  { %p387_p1 = pnand %p385_p0, %p382_p13 }
 0x1a2   :  { %390 = shalt.err (!%p387_p1)
}
 0x1a3   :  { %250 = dma.vmem_to_hbm [thread:$0]  %s245_s1, 256, %s480_s2, [#allocation4], %s396_s19, %s396_s19, %s397_s20  }
 0x1a4   :  { %393 = dma.done.wait [#allocation4], 256  }
 0x1a5   :  { %394 = vsyncadd [#allocation4], 4294967040 }
 0x1a6   :  { %254 = vsyncpa [#allocation3], 1 }
 0x1a7   :  { %255 = vsyncpa [#allocation4], 1 }

</bundles_post_ra>
